<compile_context>
chip_gen: v6e
topology: v6e:2x2x1
jax: 0.10.0
libtpu: 0.0.40
codegen_flags: <defaults>
</compile_context>

<pallas_src>
import math

import jax
import jax.numpy as jnp
from jax.experimental import pallas as pl
from jax.experimental.pallas import tpu as pltpu


def _gated_fusion_kernel(b_ref, w_ref, *refs):
    # b_ref : SMEM (M,)       gating Linear bias (scalars)
    # w_ref : VMEM (M, D, M)  gating Linear weight, reshaped per-modality, resident
    # refs  : M VMEM (TB, D)  per-modality feature tiles, then the (TB, D) output
    *x_refs, o_ref = refs
    num_modalities = len(x_refs)

    # Gating logits: logits[b, n] = sum_m x_m[b, :] @ w[m, :, n]   -> (TB, M)
    # Native-dtype ref reads go straight into the MXU dot with f32 accumulation.
    logits = jnp.dot(x_refs[0][...], w_ref[0], preferred_element_type=jnp.float32)
    for m in range(1, num_modalities):
        logits = logits + jnp.dot(x_refs[m][...], w_ref[m],
                                  preferred_element_type=jnp.float32)

    # Softmax over modalities, column-wise on (TB, 1) vectors; bias from SMEM.
    cols = [logits[:, m:m + 1] + b_ref[m] for m in range(num_modalities)]
    row_max = cols[0]
    for m in range(1, num_modalities):
        row_max = jnp.maximum(row_max, cols[m])
    exps = [jnp.exp(c - row_max) for c in cols]
    denom = exps[0]
    for m in range(1, num_modalities):
        denom = denom + exps[m]
    inv_denom = pl.reciprocal(denom, approx=True)    # EUP vrcp slot, ~free

    # Weighted sum with the reciprocal deferred: fused = (sum_m e_m * x_m) * inv.
    # Refs are re-read here (already resident in VMEM); saves M-1 (TB,1) muls.
    fused = exps[0] * x_refs[0][...].astype(jnp.float32)
    for m in range(1, num_modalities):
        fused = fused + exps[m] * x_refs[m][...].astype(jnp.float32)
    fused = fused * inv_denom

    o_ref[...] = fused.astype(o_ref.dtype)


def gated_fusion(features, w, b, *, tb=None):
    """features: list of M arrays, each (B, D).
    w: (M*D, M)  -- NOTE: this is the transpose of PyTorch nn.Linear's (M, M*D)
       weight; concat order matches torch.cat(features, dim=-1).
    b: (M,)."""
    num_modalities = len(features)
    B, D = features[0].shape
    assert w.shape == (num_modalities * D, num_modalities), \
        "expected gating weight of shape (M*D, M) (i.e. nn.Linear weight.T)"
    assert b.shape == (num_modalities,)

    # w[m*D + d, n] -> w_r[m, d, n]  (per-modality (D, M) slabs)
    w_r = w.reshape(num_modalities, D, num_modalities)
    out_dtype = features[0].dtype
    itemsize = jnp.dtype(out_dtype).itemsize

    if tb is None:
        # Mem-bound sweet spot: 1024-2048 rows (v5e scoped-VMEM safe, near the
        # roofline plateau on v6e, amortizes per-step overhead on v7x) ...
        tb = min(B, 2048)
        # ... while guaranteeing >= 2 grid steps when the batch allows, so both
        # v7x TensorCores get work under the "parallel" batch axis.
        if B > 8:
            half = ((pl.cdiv(B, 2) + 7) // 8) * 8
            tb = min(tb, half)
    if tb != B and tb % 8 != 0:
        tb = max(8, (tb // 8) * 8)
    grid = (pl.cdiv(B, tb),)

    m = num_modalities
    cost = pl.CostEstimate(
        flops=2 * m * m * B * D + 3 * m * B * D,
        transcendentals=m * B,
        bytes_accessed=(m + 1) * B * D * itemsize + w.size * jnp.dtype(w.dtype).itemsize,
    )

    feat_spec = pl.BlockSpec((tb, D), lambda i: (i, 0))
    return pl.pallas_call(
        _gated_fusion_kernel,
        out_shape=jax.ShapeDtypeStruct((B, D), out_dtype),
        grid=grid,
        in_specs=[
            pl.BlockSpec(memory_space=pltpu.MemorySpace.SMEM),          # bias (M,)
            pl.BlockSpec((m, D, m), lambda i: (0, 0, 0)),               # weight, resident
        ] + [feat_spec] * m,                                            # M feature inputs
        out_specs=pl.BlockSpec((tb, D), lambda i: (i, 0)),
        compiler_params=pltpu.CompilerParams(
            dimension_semantics=("parallel",),
        ),
        cost_estimate=cost,
    )(b, w_r, *features)


def gated_fusion_reference(features, w, b):
    feats = jnp.stack(features, axis=1)              # (B, M, D)
    B, M, D = feats.shape
    concat = feats.reshape(B, M * D)
    logits = concat @ w + b
    gates = jax.nn.softmax(logits, axis=-1)
    return jnp.sum(feats * gates[:, :, None], axis=1)


if __name__ == "__main__":
    # Small, deterministic example shapes.
    B = 32         # batch
    D = 128        # embedding_dim
    M = 4          # num_modalities

    key = jax.random.PRNGKey(0)
    k_feats, k_w, k_b = jax.random.split(key, 3)

    # Modality features: list of (B, D) tensors (passed as separate inputs).
    feats_all = jax.random.normal(k_feats, (M, B, D), dtype=jnp.float32)
    features = [feats_all[m] for m in range(M)]

    # Gating Linear parameters (deterministic init, PyTorch-style uniform bound).
    bound = 1.0 / math.sqrt(M * D)
    w = jax.random.uniform(k_w, (M * D, M), minval=-bound, maxval=bound,
                           dtype=jnp.float32)
    b = jax.random.uniform(k_b, (M,), minval=-bound, maxval=bound,
                           dtype=jnp.float32)

    # tb=8 -> 4-step "parallel" batch grid, exercising the pipelined path.
    out = gated_fusion(features, w, b, tb=8)
    out = jax.block_until_ready(out)

    ref = gated_fusion_reference(features, w, b)
    assert out.shape == (B, D)
    # approx=True reciprocal (EUP) has ~1e-4 relative error in the softmax
    # normalization; tolerance set accordingly.
    assert jnp.allclose(out, ref, atol=2e-3, rtol=2e-3), "mismatch vs reference"

    print("KERNEL_OK")
</pallas_src>

<mosaic_0001>
module attributes {stable_mosaic.version = 11 : i64} {
  func.func @_gated_fusion_kernel(%arg0: i32, %arg1: memref<4xf32, #tpu.memory_space<smem>>, %arg2: memref<4x128x4xf32, #tpu.memory_space<vmem>>, %arg3: memref<8x128xf32, #tpu.memory_space<vmem>>, %arg4: memref<8x128xf32, #tpu.memory_space<vmem>>, %arg5: memref<8x128xf32, #tpu.memory_space<vmem>>, %arg6: memref<8x128xf32, #tpu.memory_space<vmem>>, %arg7: memref<8x128xf32, #tpu.memory_space<vmem>>) attributes {dimension_semantics = [#tpu.dimension_semantics<parallel>], iteration_bounds = array<i64: 4>, scalar_prefetch = 0 : i64, scratch_operands = 0 : i64, tpu.core_type = #tpu.core_type<tc>, window_params = [{transform_indices = @transform_0, window_bounds = array<i64: 4>}, {pipeline_mode = #tpu.pipeline_mode<synchronous>, transform_indices = @transform_1, window_bounds = array<i64: 4, 128, 4>}, {transform_indices = @transform_2, window_bounds = array<i64: 8, 128>}, {transform_indices = @transform_3, window_bounds = array<i64: 8, 128>}, {transform_indices = @transform_4, window_bounds = array<i64: 8, 128>}, {transform_indices = @transform_5, window_bounds = array<i64: 8, 128>}, {transform_indices = @transform_6, window_bounds = array<i64: 8, 128>}]} {
    %c0 = arith.constant 0 : index
    %c0_0 = arith.constant 0 : index
    %0 = vector.load %arg3[%c0, %c0_0] : memref<8x128xf32, #tpu.memory_space<vmem>>, vector<8x128xf32>
    %c0_1 = arith.constant 0 : index
    %c0_2 = arith.constant 0 : index
    %c0_3 = arith.constant 0 : index
    %1 = vector.load %arg2[%c0_1, %c0_2, %c0_3] : memref<4x128x4xf32, #tpu.memory_space<vmem>>, vector<1x128x4xf32>
    %2 = vector.shape_cast %1 : vector<1x128x4xf32> to vector<128x4xf32>
    %cst = arith.constant dense<0.000000e+00> : vector<8x4xf32>
    %3 = tpu.matmul %0, %2, %cst {dimension_numbers = #tpu.dot_dimension_numbers<[1], [0], [0], [1], [0, 0, 1, 1], [], []>} : vector<8x128xf32>, vector<128x4xf32>, vector<8x4xf32> -> vector<8x4xf32>
    %c0_4 = arith.constant 0 : index
    %c0_5 = arith.constant 0 : index
    %4 = vector.load %arg4[%c0_4, %c0_5] : memref<8x128xf32, #tpu.memory_space<vmem>>, vector<8x128xf32>
    %c1 = arith.constant 1 : index
    %c0_6 = arith.constant 0 : index
    %c0_7 = arith.constant 0 : index
    %5 = vector.load %arg2[%c1, %c0_6, %c0_7] : memref<4x128x4xf32, #tpu.memory_space<vmem>>, vector<1x128x4xf32>
    %6 = vector.shape_cast %5 : vector<1x128x4xf32> to vector<128x4xf32>
    %cst_8 = arith.constant dense<0.000000e+00> : vector<8x4xf32>
    %7 = tpu.matmul %4, %6, %cst_8 {dimension_numbers = #tpu.dot_dimension_numbers<[1], [0], [0], [1], [0, 0, 1, 1], [], []>} : vector<8x128xf32>, vector<128x4xf32>, vector<8x4xf32> -> vector<8x4xf32>
    %8 = arith.addf %3, %7 : vector<8x4xf32>
    %c0_9 = arith.constant 0 : index
    %c0_10 = arith.constant 0 : index
    %9 = vector.load %arg5[%c0_9, %c0_10] : memref<8x128xf32, #tpu.memory_space<vmem>>, vector<8x128xf32>
    %c2 = arith.constant 2 : index
    %c0_11 = arith.constant 0 : index
    %c0_12 = arith.constant 0 : index
    %10 = vector.load %arg2[%c2, %c0_11, %c0_12] : memref<4x128x4xf32, #tpu.memory_space<vmem>>, vector<1x128x4xf32>
    %11 = vector.shape_cast %10 : vector<1x128x4xf32> to vector<128x4xf32>
    %cst_13 = arith.constant dense<0.000000e+00> : vector<8x4xf32>
    %12 = tpu.matmul %9, %11, %cst_13 {dimension_numbers = #tpu.dot_dimension_numbers<[1], [0], [0], [1], [0, 0, 1, 1], [], []>} : vector<8x128xf32>, vector<128x4xf32>, vector<8x4xf32> -> vector<8x4xf32>
    %13 = arith.addf %8, %12 : vector<8x4xf32>
    %c0_14 = arith.constant 0 : index
    %c0_15 = arith.constant 0 : index
    %14 = vector.load %arg6[%c0_14, %c0_15] : memref<8x128xf32, #tpu.memory_space<vmem>>, vector<8x128xf32>
    %c3 = arith.constant 3 : index
    %c0_16 = arith.constant 0 : index
    %c0_17 = arith.constant 0 : index
    %15 = vector.load %arg2[%c3, %c0_16, %c0_17] : memref<4x128x4xf32, #tpu.memory_space<vmem>>, vector<1x128x4xf32>
    %16 = vector.shape_cast %15 : vector<1x128x4xf32> to vector<128x4xf32>
    %cst_18 = arith.constant dense<0.000000e+00> : vector<8x4xf32>
    %17 = tpu.matmul %14, %16, %cst_18 {dimension_numbers = #tpu.dot_dimension_numbers<[1], [0], [0], [1], [0, 0, 1, 1], [], []>} : vector<8x128xf32>, vector<128x4xf32>, vector<8x4xf32> -> vector<8x4xf32>
    %18 = arith.addf %13, %17 : vector<8x4xf32>
    %19 = vector.extract_strided_slice %18 {offsets = [0, 0], sizes = [8, 1], strides = [1, 1]} : vector<8x4xf32> to vector<8x1xf32>
    %c0_19 = arith.constant 0 : index
    %20 = memref.load %arg1[%c0_19] : memref<4xf32, #tpu.memory_space<smem>>
    %21 = vector.broadcast %20 : f32 to vector<8x1xf32>
    %22 = arith.addf %19, %21 : vector<8x1xf32>
    %23 = vector.extract_strided_slice %18 {offsets = [0, 1], sizes = [8, 1], strides = [1, 1]} : vector<8x4xf32> to vector<8x1xf32>
    %c1_20 = arith.constant 1 : index
    %24 = memref.load %arg1[%c1_20] : memref<4xf32, #tpu.memory_space<smem>>
    %25 = vector.broadcast %24 : f32 to vector<8x1xf32>
    %26 = arith.addf %23, %25 : vector<8x1xf32>
    %27 = vector.extract_strided_slice %18 {offsets = [0, 2], sizes = [8, 1], strides = [1, 1]} : vector<8x4xf32> to vector<8x1xf32>
    %c2_21 = arith.constant 2 : index
    %28 = memref.load %arg1[%c2_21] : memref<4xf32, #tpu.memory_space<smem>>
    %29 = vector.broadcast %28 : f32 to vector<8x1xf32>
    %30 = arith.addf %27, %29 : vector<8x1xf32>
    %31 = vector.extract_strided_slice %18 {offsets = [0, 3], sizes = [8, 1], strides = [1, 1]} : vector<8x4xf32> to vector<8x1xf32>
    %c3_22 = arith.constant 3 : index
    %32 = memref.load %arg1[%c3_22] : memref<4xf32, #tpu.memory_space<smem>>
    %33 = vector.broadcast %32 : f32 to vector<8x1xf32>
    %34 = arith.addf %31, %33 : vector<8x1xf32>
    %35 = arith.maximumf %22, %26 : vector<8x1xf32>
    %36 = arith.maximumf %35, %30 : vector<8x1xf32>
    %37 = arith.maximumf %36, %34 : vector<8x1xf32>
    %38 = arith.subf %22, %37 : vector<8x1xf32>
    %39 = math.exp %38 : vector<8x1xf32>
    %40 = arith.subf %26, %37 : vector<8x1xf32>
    %41 = math.exp %40 : vector<8x1xf32>
    %42 = arith.subf %30, %37 : vector<8x1xf32>
    %43 = math.exp %42 : vector<8x1xf32>
    %44 = arith.subf %34, %37 : vector<8x1xf32>
    %45 = math.exp %44 : vector<8x1xf32>
    %46 = arith.addf %39, %41 : vector<8x1xf32>
    %47 = arith.addf %46, %43 : vector<8x1xf32>
    %48 = arith.addf %47, %45 : vector<8x1xf32>
    %49 = tpu.reciprocal %48 {approx = true} : vector<8x1xf32> -> vector<8x1xf32>
    %c0_23 = arith.constant 0 : index
    %c0_24 = arith.constant 0 : index
    %50 = vector.load %arg3[%c0_23, %c0_24] : memref<8x128xf32, #tpu.memory_space<vmem>>, vector<8x128xf32>
    %51 = vector.broadcast %39 : vector<8x1xf32> to vector<8x128xf32>
    %52 = arith.mulf %51, %50 : vector<8x128xf32>
    %c0_25 = arith.constant 0 : index
    %c0_26 = arith.constant 0 : index
    %53 = vector.load %arg4[%c0_25, %c0_26] : memref<8x128xf32, #tpu.memory_space<vmem>>, vector<8x128xf32>
    %54 = vector.broadcast %41 : vector<8x1xf32> to vector<8x128xf32>
    %55 = arith.mulf %54, %53 : vector<8x128xf32>
    %56 = arith.addf %52, %55 : vector<8x128xf32>
    %c0_27 = arith.constant 0 : index
    %c0_28 = arith.constant 0 : index
    %57 = vector.load %arg5[%c0_27, %c0_28] : memref<8x128xf32, #tpu.memory_space<vmem>>, vector<8x128xf32>
    %58 = vector.broadcast %43 : vector<8x1xf32> to vector<8x128xf32>
    %59 = arith.mulf %58, %57 : vector<8x128xf32>
    %60 = arith.addf %56, %59 : vector<8x128xf32>
    %c0_29 = arith.constant 0 : index
    %c0_30 = arith.constant 0 : index
    %61 = vector.load %arg6[%c0_29, %c0_30] : memref<8x128xf32, #tpu.memory_space<vmem>>, vector<8x128xf32>
    %62 = vector.broadcast %45 : vector<8x1xf32> to vector<8x128xf32>
    %63 = arith.mulf %62, %61 : vector<8x128xf32>
    %64 = arith.addf %60, %63 : vector<8x128xf32>
    %65 = vector.broadcast %49 : vector<8x1xf32> to vector<8x128xf32>
    %66 = arith.mulf %64, %65 : vector<8x128xf32>
    %c0_31 = arith.constant 0 : index
    %c0_32 = arith.constant 0 : index
    %67 = vector.load %arg7[%c0_31, %c0_32] : memref<8x128xf32, #tpu.memory_space<vmem>>, vector<8x128xf32>
    tpu.vector_store %arg7[%c0_31, %c0_32], %66 {strides = array<i32>} : memref<8x128xf32, #tpu.memory_space<vmem>>, vector<8x128xf32>,
    return
  }
  func.func @transform_0(%arg0: i32) -> i32 {
    %c0_i32 = arith.constant 0 : i32
    %c0_i32_0 = arith.constant 0 : i32
    return %c0_i32 : i32
  }
  func.func @transform_1(%arg0: i32) -> (i32, i32, i32) {
    %c0_i32 = arith.constant 0 : i32
    %c0_i32_0 = arith.constant 0 : i32
    %c0_i32_1 = arith.constant 0 : i32
    %c0_i32_2 = arith.constant 0 : i32
    return %c0_i32, %c0_i32_0, %c0_i32_1 : i32, i32, i32
  }
  func.func @transform_2(%arg0: i32) -> (i32, i32) {
    %c0_i32 = arith.constant 0 : i32
    %c0_i32_0 = arith.constant 0 : i32
    return %arg0, %c0_i32 : i32, i32
  }
  func.func @transform_3(%arg0: i32) -> (i32, i32) {
    %c0_i32 = arith.constant 0 : i32
    %c0_i32_0 = arith.constant 0 : i32
    return %arg0, %c0_i32 : i32, i32
  }
  func.func @transform_4(%arg0: i32) -> (i32, i32) {
    %c0_i32 = arith.constant 0 : i32
    %c0_i32_0 = arith.constant 0 : i32
    return %arg0, %c0_i32 : i32, i32
  }
  func.func @transform_5(%arg0: i32) -> (i32, i32) {
    %c0_i32 = arith.constant 0 : i32
    %c0_i32_0 = arith.constant 0 : i32
    return %arg0, %c0_i32 : i32, i32
  }
  func.func @transform_6(%arg0: i32) -> (i32, i32) {
    %c0_i32 = arith.constant 0 : i32
    %c0_i32_0 = arith.constant 0 : i32
    return %arg0, %c0_i32 : i32, i32
  }
}

</mosaic_0001>

<bundles_post_ra>
// kernel: tpu_custom_call.1
= control target key start
LH: loop header
LB: loop body
LE: loop exit
PB: predicated region body
PF: predicated region fallthrough
CT: control target
= control target key end

     0   :  { %11 = vsyncpa [#allocation4], 0  ;;  %s1769_s0 = inlined_call_operand.vmem [shape: f32[4], index: 0, kind: input, shape index: {}]   ;;  %s1770_s1 = inlined_call_operand.vmem [shape: f32[4,128,4], index: 1, kind: input, shape index: {}]   ;;  %s1771_s2 = inlined_call_operand.vmem [shape: f32[32,128], index: 2, kind: input, shape index: {}]   ;;  %s1772_s3 = inlined_call_operand.vmem [shape: f32[32,128], index: 3, kind: input, shape index: {}]   ;;  %s1773_s4 = inlined_call_operand.vmem [shape: f32[32,128], index: 4, kind: input, shape index: {}]   ;;  %s1774_s5 = inlined_call_operand.vmem [shape: f32[32,128], index: 5, kind: input, shape index: {}]   ;;  %s1775_s6 = inlined_call_operand.hbm [shape: f32[32,128], index: 6, kind: output, shape index: {}]  }
   0x1   :  { %12 = vsyncpa [#allocation3], 0 }
   0x2   :  { %14 = vsyncpa [#allocation3 + $0x1], 0  ;;  %s1363_s21 = smov 0   ;;  %s1365_s22 = smov 0  }
   0x3   :  { %s1367_s23 = smov 0   ;;  %s1369_s24 = smov 0  }
   0x4 LB: > { %s1384_s25 = sadd.s32 4294967295, %s1312_s24   ;;  %s882_s26 = sadd.s32 4294967294, %s1312_s24   ;;  %s1312_s24 = sphi %s1369_s24, %s1782_s24   ;;  %s1308_s23 = sphi %s1367_s23, %s1781_s23   ;;  %s1304_s22 = sphi %s1365_s22, %s1780_s22   ;;  %s1300_s21 = sphi %s1363_s21, %s1779_s21  }
   0x5   : > { %s1388_s27 = sadd.s32 1, %s1312_s24   ;;  %s173_s28 = sadd.s32 1, %s1308_s23 }
   0x6   : > { %s170_s29 = ssub.s32 %s1312_s24, %s1388_s27  ;;  %p183_p0 = scmp.ne.s32.totalorder %s1308_s23, %s1304_s22 }
   0x7   : > { %p171_p1 = scmp.eq.s32.totalorder %s170_s29, 0  ;;  %p184_p2 = scmp.eq.s32.totalorder %s1384_s25, 3 }
   0x8   : > { %p189_p3 = scmp.ne.s32.totalorder %s1304_s22, %s1300_s21  ;;  %p190_p4 = scmp.eq.s32.totalorder %s882_s26, 3 }
   0x9   : > { %s1399_s30 = scalar_select %p171_p1, %s1308_s23, %s173_s28  }
   0xa   : > { %p1401_p5 = por %p184_p2, %p183_p0  ;;  %p1405_p6 = por %p190_p4, %p189_p3 }
   0xb   : > { %p883_p7 = scmp.ge.s32.totalorder %s1312_s24, 1  ;;  %p197_p8 = scmp.lt.s32.totalorder %s1312_s24, 5 }
   0xc   : > { %p1170_p9 = scmp.eq.s32.totalorder %s1384_s25, 0  ;;  %s210_s12 = sshll.u32 %s1769_s0, 4  ;;  %s211_s12 = int_to_ptr.vmem [resolvable:$true] %s210_s12 }
   0xd   : > { %p1412_p10 = pnand %p883_p7, %p197_p8  ;;  %s1233_s13 = scalar_lea.vmem %s211_s12, 16 }
   0xe   : > { %p1234_p13 = scmp.ne.s32.totalorder %s211_s12, %s1233_s13  ;;  %p1241_p3 = scmp.lt.s32.totalorder %s211_s12, %s211_s12 }
   0xf   : > { %p1162_p11 = pneg %p1412_p10  ;;  %p1242_p4 = scmp.lt.s32.totalorder %s1233_s13, %s1233_s13 }
  0x11   : > { %p1163_p12 = pnand %p1170_p9, %p1162_p11  ;;  %p1243_p7 = por %p1242_p4, %p1241_p3 }
  0x13   : > { %p1235_p0 = pneg %p1163_p12 }
  0x15   : > { %p1236_p1 = pnand %p1235_p0, %p1234_p13 }
  0x17   : > { %p1237_p2 = pneg %p1236_p1 }
  0x19   : > { %p1244_p8 = pnand %p1243_p7, %p1237_p2 }
  0x1b   : > { %1247 = shalt.err (!%p1244_p8)
}
  0x1c   : > { %s1314_s14 = smov [#allocation2]   ;;  %254 = sbr.rel (%p1412_p10) target bundleno = 834 (0x342), region = 44 }
  0x1d   : > { %1165 = dma.vmem_to_smem (!%p1163_p12), %s211_s12, 16, %s1314_s14, [#allocation4]  }
  0x21   : > { %1291 = dma.done.wait (%p1170_p9), [#allocation4], 16  }
  0x22   : > { %1293 = vsyncadd (%p1170_p9), [#allocation4], 4294967280 }
  0x23   : > { %260 = sfence }
  0x24   : > { %v908_v0 = vld [vmem:[%s1770_s1 + $0xf8] sm:$0xff]  ;;  %v1315_v2 = vmov 0.0   ;;  %v907_v3 = vld [vmem:[%s1770_s1 + $0xf0] sm:$0xff]  ;;  %v906_v5 = vld [vmem:[%s1770_s1 + $0xe8] sm:$0xff]  ;;  %p296_p9 = scmp.lt.s32.totalorder %s1384_s25, 3  ;;  %vm1316_vm0 = vmmov 0  }
  0x25   : > { %v328_v1 = vld [vmem:[%s1770_s1 + $0x78] sm:$0xff]  ;;  %1016 = vmatprep.subr.mxu0 %v1315_v2  ;;  %1051 = vmatprep.subr.mxu1 %v1315_v2  ;;  %v327_v4 = vld [vmem:[%s1770_s1 + $0x70] sm:$0xff]  ;;  %v326_v6 = vld [vmem:[%s1770_s1 + $0x68] sm:$0xff]  ;;  %s941_s13 = sld [smem:[#allocation2 + $0x1]]  ;;  %s1317_s15 = smov 125  }
  0x26   : > { %1017 = vmatpush3.msra.mxu0 %v908_v0  ;;  %1052 = vmatpush3.msra.mxu1 %v328_v1  ;;  %v905_v7 = vld [vmem:[%s1770_s1 + $0xe0] sm:$0xff]  ;;  %v904_v9 = vld [vmem:[%s1770_s1 + $0xd8] sm:$0xff]  ;;  %v903_v11 = vld [vmem:[%s1770_s1 + $0xd0] sm:$0xff]  ;;  %s297_s14 = scalar_select %p296_p9, %s1384_s25, 3 }
  0x27   : > { %1018 = vmatprep.subr.mxu0 %v1315_v2  ;;  %1053 = vmatprep.subr.mxu1 %v1315_v2  ;;  %v325_v8 = vld [vmem:[%s1770_s1 + $0x60] sm:$0xff]  ;;  %v324_v10 = vld [vmem:[%s1770_s1 + $0x58] sm:$0xff]  ;;  %v323_v12 = vld [vmem:[%s1770_s1 + $0x50] sm:$0xff]  ;;  %s1318_s16 = smov 127   ;;  %s1319_s17 = smov 126  }
  0x28   : > { %1019 = vmatpush3.msra.mxu0 %v907_v3  ;;  %1054 = vmatpush3.msra.mxu1 %v327_v4  ;;  %v902_v13 = vld [vmem:[%s1770_s1 + $0xc8] sm:$0xff]  ;;  %v901_v15 = vld [vmem:[%s1770_s1 + $0xc0] sm:$0xff]  ;;  %v900_v17 = vld [vmem:[%s1770_s1 + $0xb8] sm:$0xff]  ;;  %s1533_s29 = sshll.u32 %s297_s14, 3  ;;  %s942_s14 = sld [smem:[#allocation2 + $0x2]] }
  0x29   : > { %1020 = vmatprep.subr.mxu0 %v1315_v2  ;;  %1055 = vmatprep.subr.mxu1 %v1315_v2  ;;  %v322_v14 = vld [vmem:[%s1770_s1 + $0x48] sm:$0xff]  ;;  %v321_v16 = vld [vmem:[%s1770_s1 + $0x40] sm:$0xff]  ;;  %v320_v18 = vld [vmem:[%s1770_s1 + $0x38] sm:$0xff]  ;;  %s303_s19 = scalar_lea.vmem %s1772_s3, %s1533_s29  ;;  %s299_s10 = scalar_lea.vmem %s1771_s2, %s1533_s29 }
  0x2a   : > { %1021 = vmatpush3.msra.mxu0 %v906_v5  ;;  %1056 = vmatpush3.msra.mxu1 %v326_v6  ;;  %v899_v19 = vld [vmem:[%s1770_s1 + $0xb0] sm:$0xff]  ;;  %v898_v21 = vld [vmem:[%s1770_s1 + $0xa8] sm:$0xff]  ;;  %v897_v23 = vld [vmem:[%s1770_s1 + $0xa0] sm:$0xff]  ;;  %s311_s28 = scalar_lea.vmem %s1774_s5, %s1533_s29  ;;  %s665_s18 = sld [smem:[#allocation2]] }
  0x2b   : > { %1022 = vmatprep.subr.mxu0 %v1315_v2  ;;  %1057 = vmatprep.subr.mxu1 %v1315_v2  ;;  %v319_v20 = vld [vmem:[%s1770_s1 + $0x30] sm:$0xff]  ;;  %v318_v22 = vld [vmem:[%s1770_s1 + $0x28] sm:$0xff]  ;;  %v317_v24 = vld [vmem:[%s1770_s1 + $0x20] sm:$0xff]  ;;  %s1321_s20 = smov 1   ;;  %s1322_s26 = smov 3  }
  0x2c   : > { %1023 = vmatpush3.msra.mxu0 %v905_v7  ;;  %1058 = vmatpush3.msra.mxu1 %v325_v8  ;;  %v896_v25 = vld [vmem:[%s1770_s1 + $0x98] sm:$0xff]  ;;  %v895_v27 = vld [vmem:[%s1770_s1 + $0x90] sm:$0xff]  ;;  %v894_v29 = vld [vmem:[%s1770_s1 + $0x88] sm:$0xff] }
  0x2d   : > { %1024 = vmatprep.subr.mxu0 %v1315_v2  ;;  %1059 = vmatprep.subr.mxu1 %v1315_v2  ;;  %v316_v26 = vld [vmem:[%s1770_s1 + $0x18] sm:$0xff]  ;;  %v315_v28 = vld [vmem:[%s1770_s1 + $0x10] sm:$0xff]  ;;  %v314_v30 = vld [vmem:[%s1770_s1 + $0x8] sm:$0xff] }
  0x2e   : > { %1025 = vmatpush3.msra.mxu0 %v904_v9  ;;  %1060 = vmatpush3.msra.mxu1 %v324_v10  ;;  %v893_v31 = vld [vmem:[%s1770_s1 + $0x80] sm:$0xff]  ;;  %v924_v35 = vld [vmem:[%s1770_s1 + $0x178] sm:$0xff]  ;;  %v923_v37 = vld [vmem:[%s1770_s1 + $0x170] sm:$0xff] }
  0x2f   : > { %1026 = vmatprep.subr.mxu0 %v1315_v2  ;;  %1061 = vmatprep.subr.mxu1 %v1315_v2  ;;  %v313_v32 = vld [vmem:[%s1770_s1] sm:$0xff]  ;;  %v940_v36 = vld [vmem:[%s1770_s1 + $0x1f8] sm:$0xff]  ;;  %v939_v38 = vld [vmem:[%s1770_s1 + $0x1f0] sm:$0xff] }
  0x30   : > { %1027 = vmatpush3.msra.mxu0 %v903_v11  ;;  %1062 = vmatpush3.msra.mxu1 %v323_v12  ;;  %v1567_v33 = vld [vmem:[%s303_s19] sm:$0xff]  ;;  %v922_v39 = vld [vmem:[%s1770_s1 + $0x168] sm:$0xff]  ;;  %v920_v43 = vld [vmem:[%s1770_s1 + $0x158] sm:$0xff]  ;;  %s307_s19 = scalar_lea.vmem %s1773_s4, %s1533_s29  ;;  %s943_s29 = sld [smem:[#allocation2 + $0x3]] }
  0x31   : > { %1028 = vmatprep.subr.mxu0 %v1315_v2  ;;  %1063 = vmatprep.subr.mxu1 %v1315_v2  ;;  %v1573_v34 = vld [vmem:[%s299_s10] sm:$0xff]  ;;  %v938_v40 = vld [vmem:[%s1770_s1 + $0x1e8] sm:$0xff]  ;;  %v936_v44 = vld [vmem:[%s1770_s1 + $0x1d8] sm:$0xff]  ;;  %s945_s10 = sshll.u32 %s1384_s25, 7 }
  0x32   : > { %1029 = vmatpush3.msra.mxu0 %v902_v13  ;;  %1064 = vmatpush3.msra.mxu1 %v322_v14  ;;  %v921_v41 = vld [vmem:[%s1770_s1 + $0x160] sm:$0xff]  ;;  %v919_v45 = vld [vmem:[%s1770_s1 + $0x150] sm:$0xff]  ;;  %v918_v47 = vld [vmem:[%s1770_s1 + $0x148] sm:$0xff] }
  0x33   : > { %1030 = vmatprep.subr.mxu0 %v1315_v2  ;;  %1065 = vmatprep.subr.mxu1 %v1315_v2  ;;  %v937_v42 = vld [vmem:[%s1770_s1 + $0x1e0] sm:$0xff]  ;;  %v935_v46 = vld [vmem:[%s1770_s1 + $0x1d0] sm:$0xff]  ;;  %v934_v48 = vld [vmem:[%s1770_s1 + $0x1c8] sm:$0xff] }
  0x34   : > { %1031 = vmatpush3.msra.mxu0 %v901_v15  ;;  %1066 = vmatpush3.msra.mxu1 %v321_v16  ;;  %v917_v49 = vld [vmem:[%s1770_s1 + $0x140] sm:$0xff]  ;;  %v916_v51 = vld [vmem:[%s1770_s1 + $0x138] sm:$0xff]  ;;  %v915_v53 = vld [vmem:[%s1770_s1 + $0x130] sm:$0xff] }
  0x35   : > { %1032 = vmatprep.subr.mxu0 %v1315_v2  ;;  %1067 = vmatprep.subr.mxu1 %v1315_v2  ;;  %v933_v50 = vld [vmem:[%s1770_s1 + $0x1c0] sm:$0xff]  ;;  %v932_v52 = vld [vmem:[%s1770_s1 + $0x1b8] sm:$0xff]  ;;  %v931_v54 = vld [vmem:[%s1770_s1 + $0x1b0] sm:$0xff] }
  0x36   : > { %1033 = vmatpush3.msra.mxu0 %v900_v17  ;;  %1068 = vmatpush3.msra.mxu1 %v320_v18  ;;  %v914_v55 = vld [vmem:[%s1770_s1 + $0x128] sm:$0xff]  ;;  %v913_v57 = vld [vmem:[%s1770_s1 + $0x120] sm:$0xff]  ;;  %v912_v59 = vld [vmem:[%s1770_s1 + $0x118] sm:$0xff]  ;;  %v675_v16 = vstv %s943_s29 }
  0x37   : > { %1034 = vmatprep.subr.mxu0 %v1315_v2  ;;  %1069 = vmatprep.subr.mxu1 %v1315_v2  ;;  %v930_v56 = vld [vmem:[%s1770_s1 + $0x1a8] sm:$0xff]  ;;  %v929_v58 = vld [vmem:[%s1770_s1 + $0x1a0] sm:$0xff]  ;;  %v928_v60 = vld [vmem:[%s1770_s1 + $0x198] sm:$0xff]  ;;  %v669_v17 = vstv %s941_s13 }
  0x38   : > { %1035 = vmatpush3.msra.mxu0 %v899_v19  ;;  %1070 = vmatpush3.msra.mxu1 %v319_v20  ;;  %v911_v61 = vld [vmem:[%s1770_s1 + $0x110] sm:$0xff]  ;;  %v910_v63 = vld [vmem:[%s1770_s1 + $0x108] sm:$0xff]  ;;  %v909_v1 = vld [vmem:[%s1770_s1 + $0x100] sm:$0xff]  ;;  %v672_v20 = vstv %s942_s14  ;;  %s773_s14 = scalar_lea.hbm %s1775_s6, %s945_s10 }
  0x39   : > { %1036 = vmatprep.subr.mxu0 %v1315_v2  ;;  %1071 = vmatprep.subr.mxu1 %v1315_v2  ;;  %v927_v62 = vld [vmem:[%s1770_s1 + $0x190] sm:$0xff]  ;;  %v926_v0 = vld [vmem:[%s1770_s1 + $0x188] sm:$0xff]  ;;  %v925_v3 = vld [vmem:[%s1770_s1 + $0x180] sm:$0xff] }
  0x3a   : > { %1037 = vmatpush3.msra.mxu0 %v898_v21  ;;  %1072 = vmatpush3.msra.mxu1 %v318_v22  ;;  %v1715_v4 = vld [vmem:[%s307_s19] sm:$0xff]  ;;  %v666_v22 = vstv %s665_s18  ;;  %s1320_s19 = smov 2  }
  0x3b   : > { %1038 = vmatprep.subr.mxu0 %v1315_v2  ;;  %1073 = vmatprep.subr.mxu1 %v1315_v2  ;;  %v1717_v5 = vld [vmem:[%s311_s28] sm:$0xff]  ;;  %s293_s28 = sand.u32 1, %s1304_s22  }
  0x3c   : > { %1039 = vmatpush3.msra.mxu0 %v897_v23  ;;  %1074 = vmatpush3.msra.mxu1 %v317_v24  ;;  %s888_s9 = sshll.u32 %s293_s28, 3 }
  0x3d   : > { %1040 = vmatprep.subr.mxu0 %v1315_v2  ;;  %1075 = vmatprep.subr.mxu1 %v1315_v2  ;;  %s295_s11 = scalar_lea.vmem [#allocation5], %s888_s9 }
  0x3e   : > { %1041 = vmatpush3.msra.mxu0 %v896_v25  ;;  %1076 = vmatpush3.msra.mxu1 %v316_v26  ;;  %s775_s12 = sshll.u32 %s295_s11, 4  ;;  %s776_s12 = int_to_ptr.vmem [resolvable:$true] %s775_s12 }
  0x3f   : > { %1042 = vmatprep.subr.mxu0 %v1315_v2  ;;  %1077 = vmatprep.subr.mxu1 %v1315_v2 }
  0x40   : > { %1043 = vmatpush3.msra.mxu0 %v895_v27  ;;  %1078 = vmatpush3.msra.mxu1 %v315_v28 }
  0x41   : > { %1044 = vmatprep.subr.mxu0 %v1315_v2  ;;  %1079 = vmatprep.subr.mxu1 %v1315_v2 }
  0x42   : > { %1045 = vmatpush3.msra.mxu0 %v894_v29  ;;  %1080 = vmatpush3.msra.mxu1 %v314_v30 }
  0x43   : > { %1046 = vmatprep.subr.mxu0 %v1315_v2  ;;  %1081 = vmatprep.subr.mxu1 %v1315_v2 }
  0x44   : > { %1047 = vmatpush3.msra.mxu0 %v893_v31  ;;  %1048 = vmatprep.mubr.msk.f32.mxu0 %vm1316_vm0, %v1315_v2  ;;  %v1323_v31 = vmov 0  }
  0x45   : > { %1082 = vmatpush3.msra.mxu1 %v313_v32  ;;  %1049 = vmatmul.mubr.f32.vlgmr.msra.gmra.mxu0 %v1567_v33  ;;  %v1324_v32 = vmov 1  }
  0x46   : > { %1083 = vmatprep.mubr.msk.f32.mxu1 %vm1316_vm0, %v1315_v2  ;;  %1086 = vmatprep.subr.mxu0 %v1315_v2 }
  0x47   : > { %1121 = vmatprep.subr.mxu1 %v1315_v2  ;;  %1084 = vmatmul.mubr.f32.vlgmr.msra.gmra.mxu1 %v1573_v34 }
  0x48   : > { %1087 = vmatpush3.msra.mxu0 %v924_v35  ;;  %1122 = vmatpush3.msra.mxu1 %v940_v36 }
  0x49   : > { %1088 = vmatprep.subr.mxu0 %v1315_v2  ;;  %1123 = vmatprep.subr.mxu1 %v1315_v2 }
  0x4a   : > { %1089 = vmatpush3.msra.mxu0 %v923_v37  ;;  %1124 = vmatpush3.msra.mxu1 %v939_v38 }
  0x4b   : > { %1090 = vmatprep.subr.mxu0 %v1315_v2  ;;  %1125 = vmatprep.subr.mxu1 %v1315_v2 }
  0x4c   : > { %1091 = vmatpush3.msra.mxu0 %v922_v39  ;;  %1126 = vmatpush3.msra.mxu1 %v938_v40 }
  0x4d   : > { %1092 = vmatprep.subr.mxu0 %v1315_v2  ;;  %1127 = vmatprep.subr.mxu1 %v1315_v2 }
  0x4e   : > { %1093 = vmatpush3.msra.mxu0 %v921_v41  ;;  %1128 = vmatpush3.msra.mxu1 %v937_v42 }
  0x4f   : > { %1094 = vmatprep.subr.mxu0 %v1315_v2  ;;  %1129 = vmatprep.subr.mxu1 %v1315_v2 }
  0x50   : > { %1095 = vmatpush3.msra.mxu0 %v920_v43  ;;  %1130 = vmatpush3.msra.mxu1 %v936_v44 }
  0x51   : > { %1096 = vmatprep.subr.mxu0 %v1315_v2  ;;  %1131 = vmatprep.subr.mxu1 %v1315_v2 }
  0x52   : > { %1097 = vmatpush3.msra.mxu0 %v919_v45  ;;  %1132 = vmatpush3.msra.mxu1 %v935_v46 }
  0x53   : > { %1098 = vmatprep.subr.mxu0 %v1315_v2  ;;  %1133 = vmatprep.subr.mxu1 %v1315_v2 }
  0x54   : > { %1099 = vmatpush3.msra.mxu0 %v918_v47  ;;  %1134 = vmatpush3.msra.mxu1 %v934_v48 }
  0x55   : > { %1100 = vmatprep.subr.mxu0 %v1315_v2  ;;  %1135 = vmatprep.subr.mxu1 %v1315_v2 }
  0x56   : > { %1101 = vmatpush3.msra.mxu0 %v917_v49  ;;  %1136 = vmatpush3.msra.mxu1 %v933_v50  ;;  %v1325_v49 = vmov 2   ;;  %v1326_v50 = vmov 3  }
  0x57   : > { %1102 = vmatprep.subr.mxu0 %v1315_v2  ;;  %1137 = vmatprep.subr.mxu1 %v1315_v2 }
  0x58   : > { %1103 = vmatpush3.msra.mxu0 %v916_v51  ;;  %1138 = vmatpush3.msra.mxu1 %v932_v52 }
  0x59   : > { %1104 = vmatprep.subr.mxu0 %v1315_v2  ;;  %1139 = vmatprep.subr.mxu1 %v1315_v2 }
  0x5a   : > { %1105 = vmatpush3.msra.mxu0 %v915_v53  ;;  %1140 = vmatpush3.msra.mxu1 %v931_v54 }
  0x5b   : > { %1106 = vmatprep.subr.mxu0 %v1315_v2  ;;  %1141 = vmatprep.subr.mxu1 %v1315_v2 }
  0x5c   : > { %1107 = vmatpush3.msra.mxu0 %v914_v55  ;;  %1142 = vmatpush3.msra.mxu1 %v930_v56 }
  0x5d   : > { %1108 = vmatprep.subr.mxu0 %v1315_v2  ;;  %1143 = vmatprep.subr.mxu1 %v1315_v2 }
  0x5e   : > { %1109 = vmatpush3.msra.mxu0 %v913_v57  ;;  %1144 = vmatpush3.msra.mxu1 %v929_v58 }
  0x5f   : > { %1110 = vmatprep.subr.mxu0 %v1315_v2  ;;  %1145 = vmatprep.subr.mxu1 %v1315_v2 }
  0x60   : > { %1111 = vmatpush3.msra.mxu0 %v912_v59  ;;  %1146 = vmatpush3.msra.mxu1 %v928_v60 }
  0x61   : > { %1112 = vmatprep.subr.mxu0 %v1315_v2  ;;  %1147 = vmatprep.subr.mxu1 %v1315_v2 }
  0x62   : > { %1113 = vmatpush3.msra.mxu0 %v911_v61  ;;  %1148 = vmatpush3.msra.mxu1 %v927_v62 }
  0x63   : > { %1114 = vmatprep.subr.mxu0 %v1315_v2  ;;  %1149 = vmatprep.subr.mxu1 %v1315_v2 }
  0x64   : > { %1115 = vmatpush3.msra.mxu0 %v910_v63  ;;  %1150 = vmatpush3.msra.mxu1 %v926_v0 }
  0x65   : > { %1116 = vmatprep.subr.mxu0 %v1315_v2  ;;  %1151 = vmatprep.subr.mxu1 %v1315_v2 }
  0x66   : > { %1117 = vmatpush3.msra.mxu0 %v909_v1  ;;  %1118 = vmatprep.mubr.msk.f32.mxu0 %vm1316_vm0, %v1315_v2 }
  0x67   : > { %1152 = vmatpush3.msra.mxu1 %v925_v3  ;;  %1153 = vmatprep.mubr.msk.f32.mxu1 %vm1316_vm0, %v1315_v2 }
  0x68   : > { %1119 = vmatmul.mubr.f32.vlgmr.msra.gmra.mxu0 %v1715_v4  ;;  %1154 = vmatmul.mubr.f32.vlgmr.msra.gmra.mxu1 %v1717_v5 }
  0x69   : > { %1218 = vset.pattern.permute.xlu1 %v1323_v31  ;;  %1219 = vset.pattern.permute.xlu0 %v1324_v32 }
 0x105   : > { %v413_v6 = vpop.f32.mrf.mxu0 }
 0x107   : > { %v483_v7 = vpop.f32.mrf.mxu1  ;;  %v1050_v8 = vpop.f32.mrf.mxu0 }
 0x108   : > { %v484_v10 = vadd.f32 %v483_v7, %v413_v6 }
 0x109   : > { %v1085_v9 = vpop.f32.mrf.mxu1 }
 0x128   : > { %v571_v11 = vpop.f32.mrf.mxu0  ;;  %v660_v12 = vpop.f32.mrf.mxu1 }
 0x129   : > { %v575_v13 = vadd.f32 %v571_v11, %v484_v10 }
 0x12a   : > { %v1120_v14 = vpop.f32.mrf.mxu0  ;;  %v1155_v15 = vpop.f32.mrf.mxu1 }
 0x12b   : > { %v664_v2 = vadd.f32 %v660_v12, %v575_v13 }
 0x12d   : > { %v676_v18 = vadd.f32 %v675_v16, %v664_v2  ;;  %v670_v19 = vadd.f32 %v669_v17, %v664_v2  ;;  %v673_v21 = vadd.f32 %v672_v20, %v664_v2  ;;  %v667_v24 = vadd.f32 %v666_v22, %v664_v2 }
 0x12f   : > { %688 = vrot.lane.b32.xlu1 %v676_v18, %s1317_s15  ;;  %678 = vrot.lane.b32.xlu0 %v670_v19, %s1318_s16 }
 0x133   : > { %683 = vrot.lane.b32.xlu0 %v673_v21, %s1319_s17 }
 0x1a1   : > { %v679_v23 = vpop.permute.xlu0 %678  ;;  %v689_v28 = vpop.permute.xlu1 %688 }
 0x1a2   : > { %v681_v25 = vmax.f32 %v667_v24, %v679_v23 }
 0x1a5   : > { %v684_v26 = vpop.permute.xlu0 %683 }
 0x1a6   : > { %v686_v27 = vmax.f32 %v681_v25, %v684_v26 }
 0x1a8   : > { %v691_v29 = vmax.f32 %v686_v27, %v689_v28 }
 0x1aa   : > { %v692_v30 = vsub.f32 %v667_v24, %v691_v29  ;;  %702 = vrot.lane.b32.xlu0 %v691_v29, %s1320_s19  ;;  %696 = vrot.lane.b32.xlu1 %v691_v29, %s1321_s20 }
 0x1ac   : > { %v693_v41 = vmul.f32 1.442695, %v692_v30 }
 0x1ae   : > { %708 = vrot.lane.b32.xlu1 %v691_v29, %s1322_s26 }
 0x21c   : > { %v703_v35 = vpop.permute.xlu0 %702  ;;  %v697_v36 = vpop.permute.xlu1 %696 }
 0x21d   : > { %v705_v37 = vsub.f32 %v673_v21, %v703_v35  ;;  %v699_v38 = vsub.f32 %v670_v19, %v697_v36 }
 0x21f   : > { %v706_v39 = vmul.f32 1.442695, %v705_v37  ;;  %v700_v40 = vmul.f32 1.442695, %v699_v38 }
 0x220   : > { %v709_v42 = vpop.permute.xlu1 %708 }
 0x221   : > { %1223 = vpow2.f32 %v706_v39  ;;  %v711_v43 = vsub.f32 %v676_v18, %v709_v42 }
 0x222   : > { %1225 = vpow2.f32 %v700_v40 }
 0x223   : > { %v712_v44 = vmul.f32 1.442695, %v711_v43  ;;  %1227 = vpow2.f32 %v693_v41 }
 0x225   : > { %1229 = vpow2.f32 %v712_v44 }
 0x22e   : > { %v1224_v45 = vpop.eup %1223 }
 0x22f   : > { %v1226_v46 = vpop.eup %1225  ;;  %720 = vrot.lane.b32.xlu1 %v1224_v45, %s1319_s17  ;;  %s1327_s17 = smov [#allocation5]  }
 0x230   : > { %715 = vrot.lane.b32.xlu0 %v1226_v46, %s1318_s16  ;;  %v1228_v47 = vpop.eup %1227  ;;  %s1248_s16 = scalar_lea.vmem %s776_s12, 128  ;;  %s1252_s18 = sshll.u32 %s1327_s17, 4  ;;  %s1253_s18 = int_to_ptr.vmem [resolvable:$false] %s1252_s18 }
 0x231   : > { %p1249_p10 = scmp.ne.s32.totalorder %s776_s12, %s1248_s16  ;;  %s1254_s25 = scalar_lea.vmem %s1253_s18, 256 }
 0x232   : > { %v1230_v48 = vpop.eup %1229  ;;  %p1255_p13 = scmp.lt.s32.totalorder %s776_s12, %s1253_s18  ;;  %p1256_p0 = scmp.lt.s32.totalorder %s1254_s25, %s1248_s16 }
 0x233   : > { %732 = vperm.xlu1 %1218, %v1228_v47   ;;  %p1250_p11 = pnand %p1249_p10, %p1401_p5 }
 0x234   : > { %725 = vrot.lane.b32.xlu0 %v1230_v48, %s1317_s15  ;;  %s762_s15 = scalar_lea.sflag [#allocation3], %s293_s28  ;;  %p1257_p1 = por %p1256_p0, %p1255_p13 }
 0x235   : > { %p1251_p12 = pneg %p1250_p11 }
 0x237   : > { %1220 = vset.pattern.permute.xlu1 %v1325_v49  ;;  %p1258_p2 = pnand %p1257_p1, %p1251_p12 }
 0x238   : > { %737 = vperm.xlu0 %1219, %v1226_v46   ;;  %743 = vperm.xlu1 %1220, %v1224_v45  }
 0x23c   : > { %1221 = vset.pattern.permute.xlu1 %v1326_v50  ;;  %1222 = vset.pattern.permute.xlu0 %v1323_v31 }
 0x23d   : > { %749 = vperm.xlu1 %1221, %v1230_v48  }
 0x2a1   : > { %v721_v53 = vpop.permute.xlu1 %720 }
 0x2a2   : > { %v716_v51 = vpop.permute.xlu0 %715 }
 0x2a3   : > { %v718_v52 = vadd.f32 %v1228_v47, %v716_v51 }
 0x2a5   : > { %v723_v54 = vadd.f32 %v721_v53, %v718_v52 }
 0x2a6   : > { %v726_v55 = vpop.permute.xlu0 %725 }
 0x2a7   : > { %v728_v56 = vadd.f32 %v726_v55, %v723_v54 }
 0x2a9   : > { %1231 = vrcp.f32 %v728_v56 }
 0x2ae   : > { %v733_v58 = vpop.permute.xlu1 %732 }
 0x2af   : > { %v735_v62 = vmul.f32 %v733_v58, %v1573_v34 }
 0x2b3   : > { %v738_v59 = vpop.permute.xlu0 %737  ;;  %v744_v60 = vpop.permute.xlu1 %743 }
 0x2b4   : > { %v740_v61 = vmul.f32 %v738_v59, %v1567_v33  ;;  %v746_v1 = vmul.f32 %v744_v60, %v1715_v4 }
 0x2b6   : > { %v1232_v57 = vpop.eup %1231  ;;  %v741_v0 = vadd.f32 %v740_v61, %v735_v62 }
 0x2b7   : > { %756 = vperm.xlu0 %1222, %v1232_v57  }
 0x2b8   : > { %v750_v63 = vpop.permute.xlu1 %749  ;;  %v747_v6 = vadd.f32 %v746_v1, %v741_v0 }
 0x2b9   : > { %v752_v3 = vmul.f32 %v750_v63, %v1717_v5 }
 0x2bb   : > { %v753_v7 = vadd.f32 %v752_v3, %v747_v6 }
 0x332   : > { %v757_v8 = vpop.permute.xlu0 %756 }
 0x333   : > { %v759_v9 = vmul.f32 %v757_v8, %v753_v7 }
 0x335   : > { %760 = vst [vmem:[%s295_s11] sm:$0xff] %v759_v9 }
 0x336   : > { %1261 = shalt.err (!%p1258_p2)
}
 0x337   : > { %s1262_s19 = scalar_lea.hbm %s773_s14, 128  ;;  %s1266_s28 = scalar_lea.hbm %s1775_s6, 512 }
 0x338   : > { %p1263_p3 = scmp.ne.s32.totalorder %s773_s14, %s1262_s19  ;;  %p1267_p8 = scmp.lt.s32.totalorder %s773_s14, %s1775_s6 }
 0x339   : > { %p1268_p9 = scmp.lt.s32.totalorder %s1266_s28, %s1262_s19 }
 0x33a   : > { %p1264_p4 = pnand %p1263_p3, %p1401_p5 }
 0x33b   : > { %p1269_p10 = por %p1268_p9, %p1267_p8 }
 0x33c   : > { %p1265_p7 = pneg %p1264_p4 }
 0x33e   : > { %p1270_p11 = pnand %p1269_p10, %p1265_p7 }
 0x340   : > { %1273 = shalt.err (!%p1270_p11)
}
 0x341   : > { %1160 = dma.vmem_to_hbm [thread:$0]  (%p1401_p5), %s776_s12, 128, %s773_s14, %s762_s15  }
 0x342 PF: > { %p1172_p12 = scmp.ge.s32.totalorder %s1312_s24, 2  ;;  %s787_s11 = sand.u32 1, %s1300_s21  }
 0x343   : > { %s788_s29 = scalar_lea.sflag [#allocation3], %s787_s11 }
 0x344   : > { %p1167_p13 = pnand %p1172_p12, %p1405_p6 }
 0x346   : > { %p1168_p0 = pneg %p1167_p13 }
 0x348   : > { %1295 = dma.done.wait (%p1168_p0), %s788_s29, 128  }
 0x349   : > { %1297 = vsyncadd (%p1168_p0), %s788_s29, 4294967168  ;;  %p17_p1 = scmp.ge.s32.totalorder %s1388_s27, 6   ;;  %s1779_s21 = smov %s1304_s22 }
 0x34a   : > { %s1780_s22 = smov %s1308_s23  ;;  %s1781_s23 = smov %s1399_s30 }
 0x34b   : > { %s1782_s24 = smov %s1388_s27  ;;  %19 = sbr.rel (!%p17_p1) target bundleno = 4 (0x4), region = 96 }
 0x350   :  { %793 = vsyncpa [#allocation3], 1 }
 0x351   :  { %795 = vsyncpa [#allocation3 + $0x1], 1 }
 0x352   :  { %796 = vsyncpa [#allocation4], 1 }
 0x353   :  { %798 = vsyncpa [#allocation4 + $0x1], 1 }

</bundles_post_ra>
